<compile_context>
chip_gen: v5e
topology: v5e:2x2
jax: 0.10.0
libtpu: 0.0.40
codegen_flags: <defaults>
</compile_context>

<pallas_src>
import functools

import jax
import jax.numpy as jnp
from jax.experimental import pallas as pl
from jax.experimental.pallas import tpu as pltpu


def _random_iou_crop_kernel(minjac_ref, u_ref, boxes_ref, img_ref,
                            boxes_out_ref, img_out_ref, keep_ref, *,
                            orig_w, orig_h, img_w,
                            min_scale, max_scale, min_ar, max_ar):
    min_jac = minjac_ref[0]                     # SMEM scalar

    # ---------------- trial geometry (trials on lanes) ---------------- #
    u = u_ref[...]                              # (4, T) uniforms
    T = u.shape[1]
    scale = min_scale + (max_scale - min_scale) * u[0:2, :]      # (2, T)
    new_w = jnp.floor(orig_w * scale[0:1, :])                    # (1, T)
    new_h = jnp.floor(orig_h * scale[1:2, :])                    # (1, T)
    aspect = new_w / jnp.maximum(new_h, 1e-9)
    valid_ar = (aspect >= min_ar) & (aspect <= max_ar)

    left = jnp.floor((orig_w - new_w) * u[2:3, :])               # (1, T)
    top = jnp.floor((orig_h - new_h) * u[3:4, :])                # (1, T)
    right = left + new_w
    bottom = top + new_h
    valid_sz = (left != right) & (top != bottom)
    tvalid = valid_ar & valid_sz                                 # (1, T)

    # -------- per-(box, trial) center test + IoU (boxes on sublanes) -- #
    boxes = boxes_ref[...]                      # (N, 4) xyxy
    x1 = boxes[:, 0:1]
    y1 = boxes[:, 1:2]
    x2 = boxes[:, 2:3]
    y2 = boxes[:, 3:4]
    cx = 0.5 * (x1 + x2)                        # (N, 1)
    cy = 0.5 * (y1 + y2)

    within = (left < cx) & (cx < right) & (top < cy) & (cy < bottom)  # (N, T)
    within_f = within.astype(jnp.float32)
    any_within = jnp.max(within_f, axis=0, keepdims=True) > 0.5       # (1, T)

    area_b = (x2 - x1) * (y2 - y1)                                    # (N, 1)
    area_c = new_w * new_h                                            # (1, T)
    iw = jnp.maximum(jnp.minimum(x2, right) - jnp.maximum(x1, left), 0.0)
    ih = jnp.maximum(jnp.minimum(y2, bottom) - jnp.maximum(y1, top), 0.0)
    inter = iw * ih                                                   # (N, T)
    union = jnp.maximum(area_b + area_c - inter, 1e-9)
    iou = inter / union
    # -1.0 sentinel is safe even for min_jac == 0.0 because acceptance also
    # requires any_within (matches torch, which only looks at within boxes).
    iou_masked = jnp.where(within, iou, -1.0)
    max_iou = jnp.max(iou_masked, axis=0, keepdims=True)              # (1, T)

    accept = tvalid & any_within & (max_iou >= min_jac)               # (1, T)

    # -------- first accepted trial (torch takes the first that passes) -- #
    trial_f = jax.lax.broadcasted_iota(jnp.int32, (1, T), 1).astype(jnp.float32)
    sel_f = jnp.min(jnp.where(accept, trial_f, float(T)),
                    axis=1, keepdims=True)                            # (1, 1)
    onehot_f = ((trial_f == sel_f) & accept).astype(jnp.float32)      # (1, T)

    any_accept = jnp.max(accept.astype(jnp.float32),
                         axis=1, keepdims=True) > 0.5                 # (1, 1)
    apply_crop = any_accept & (min_jac < 1.0)                         # (1, 1)

    def pick(row):                            # (1, T) -> (1, 1) selected value
        return jnp.sum(row * onehot_f, axis=1, keepdims=True)

    left_s = pick(left)
    top_s = pick(top)
    new_w_s = pick(new_w)
    new_h_s = pick(new_h)

    # -------- boxes: shift by (left, top), clamp to crop size ---------- #
    col = jax.lax.broadcasted_iota(jnp.int32, boxes.shape, 1)         # (N, 4)
    is_x = (col & 1) == 0
    offs = jnp.where(is_x, left_s, top_s)
    maxs = jnp.where(is_x, new_w_s, new_h_s)
    adj = jnp.clip(boxes - offs, 0.0, maxs)
    boxes_out_ref[...] = jnp.where(apply_crop, adj, boxes)

    # -------- keep mask: boxes whose centre lies inside the crop ------- #
    keep_col = jnp.max(within_f * onehot_f, axis=1, keepdims=True)    # (N, 1)
    keep_ref[...] = jnp.where(apply_crop, keep_col, 1.0)

    # -------- image: zero outside the crop window (fixed-shape crop) --- #
    img = img_ref[...]                         # (C, H*W), lane-dense
    hw = img.shape[1]
    idx = jax.lax.broadcasted_iota(jnp.int32, (1, hw), 1).astype(jnp.float32)
    yy = jnp.floor(idx / float(img_w))
    xx = idx - yy * float(img_w)
    inside = ((xx >= left_s) & (xx < left_s + new_w_s)
              & (yy >= top_s) & (yy < top_s + new_h_s))               # (1, HW)
    keep_px = inside | jnp.logical_not(apply_crop)
    img_out_ref[...] = jnp.where(keep_px, img,
                                 jnp.zeros_like(img)).astype(img_out_ref.dtype)


def random_iou_crop(image, boxes, labels, key, *,
                    min_scale=0.3, max_scale=1.0,
                    min_aspect_ratio=0.5, max_aspect_ratio=2.0,
                    sampler_options=(0.0, 0.1, 0.3, 0.5, 0.7, 0.9, 1.0),
                    trials=40):
    C, H, W = image.shape
    N = boxes.shape[0]

    k_opt, k_u = jax.random.split(key, 2)

    # Sample the min-jaccard option (rows 0/1 of u: scale w/h; 2/3: left/top).
    options_arr = jnp.asarray(sampler_options, jnp.float32)
    idx = jax.random.randint(k_opt, (), 0, len(sampler_options))
    minjac_arr = jnp.reshape(options_arr[idx], (1,)).astype(jnp.float32)
    u = jax.random.uniform(k_u, (4, trials), jnp.float32)

    boxes_f = boxes.astype(jnp.float32)
    img_flat = image.reshape(C, H * W)        # lane-dense image layout

    kernel = functools.partial(
        _random_iou_crop_kernel,
        orig_w=float(W), orig_h=float(H), img_w=W,
        min_scale=float(min_scale), max_scale=float(max_scale),
        min_ar=float(min_aspect_ratio), max_ar=float(max_aspect_ratio))

    vmem = pl.BlockSpec(memory_space=pltpu.MemorySpace.VMEM)
    smem = pl.BlockSpec(memory_space=pltpu.MemorySpace.SMEM)

    boxes_out, img_flat_out, keep_f = pl.pallas_call(
        kernel,
        out_shape=(jax.ShapeDtypeStruct((N, 4), jnp.float32),
                   jax.ShapeDtypeStruct((C, H * W), image.dtype),
                   jax.ShapeDtypeStruct((N, 1), jnp.float32)),
        in_specs=[smem, vmem, vmem, vmem],
        out_specs=(vmem, vmem, vmem),
    )(minjac_arr, u, boxes_f, img_flat)

    img_out = img_flat_out.reshape(C, H, W)
    keep = keep_f[:, 0] > 0.5
    target_out = {"boxes": boxes_out, "labels": labels, "keep": keep}
    return img_out, target_out


if __name__ == "__main__":
    key = jax.random.PRNGKey(0)
    k_img, k_xy, k_wh, k_crop = jax.random.split(key, 4)

    C, H, W = 3, 16, 16
    N = 8
    image = jax.random.uniform(k_img, (C, H, W), jnp.float32)
    xy1 = jax.random.uniform(k_xy, (N, 2), jnp.float32, minval=0.0, maxval=8.0)
    wh = jax.random.uniform(k_wh, (N, 2), jnp.float32, minval=2.0, maxval=8.0)
    boxes = jnp.concatenate([xy1, xy1 + wh], axis=1)          # (N, 4) xyxy
    labels = jnp.arange(1, N + 1, dtype=jnp.int32)

    img_out, target_out = random_iou_crop(image, boxes, labels, k_crop)
    jax.block_until_ready((img_out, target_out["boxes"], target_out["keep"]))
    print("KERNEL_OK")
</pallas_src>

<mosaic_0001>
module attributes {stable_mosaic.version = 11 : i64} {
  func.func @_random_iou_crop_kernel(%arg0: memref<1xf32, #tpu.memory_space<smem>>, %arg1: memref<4x40xf32, #tpu.memory_space<vmem>>, %arg2: memref<8x4xf32, #tpu.memory_space<vmem>>, %arg3: memref<3x256xf32, #tpu.memory_space<vmem>>, %arg4: memref<8x4xf32, #tpu.memory_space<vmem>>, %arg5: memref<3x256xf32, #tpu.memory_space<vmem>>, %arg6: memref<8x1xf32, #tpu.memory_space<vmem>>) attributes {dimension_semantics = [], scalar_prefetch = 0 : i64, scratch_operands = 0 : i64, tpu.core_type = #tpu.core_type<tc>} {
    %c0 = arith.constant 0 : index
    %0 = memref.load %arg0[%c0] : memref<1xf32, #tpu.memory_space<smem>>
    %c0_0 = arith.constant 0 : index
    %c0_1 = arith.constant 0 : index
    %1 = vector.load %arg1[%c0_0, %c0_1] : memref<4x40xf32, #tpu.memory_space<vmem>>, vector<4x40xf32>
    %2 = vector.extract_strided_slice %1 {offsets = [0, 0], sizes = [2, 40], strides = [1, 1]} : vector<4x40xf32> to vector<2x40xf32>
    %cst = arith.constant 0.699999988 : f32
    %3 = vector.broadcast %cst : f32 to vector<2x40xf32>
    %4 = arith.mulf %3, %2 : vector<2x40xf32>
    %cst_2 = arith.constant 3.000000e-01 : f32
    %5 = vector.broadcast %cst_2 : f32 to vector<2x40xf32>
    %6 = arith.addf %5, %4 : vector<2x40xf32>
    %7 = vector.extract_strided_slice %6 {offsets = [0, 0], sizes = [1, 40], strides = [1, 1]} : vector<2x40xf32> to vector<1x40xf32>
    %cst_3 = arith.constant 1.600000e+01 : f32
    %8 = vector.broadcast %cst_3 : f32 to vector<1x40xf32>
    %9 = arith.mulf %8, %7 : vector<1x40xf32>
    %10 = math.floor %9 : vector<1x40xf32>
    %11 = vector.extract_strided_slice %6 {offsets = [1, 0], sizes = [1, 40], strides = [1, 1]} : vector<2x40xf32> to vector<1x40xf32>
    %cst_4 = arith.constant 1.600000e+01 : f32
    %12 = vector.broadcast %cst_4 : f32 to vector<1x40xf32>
    %13 = arith.mulf %12, %11 : vector<1x40xf32>
    %14 = math.floor %13 : vector<1x40xf32>
    %cst_5 = arith.constant 9.99999971E-10 : f32
    %15 = vector.broadcast %cst_5 : f32 to vector<1x40xf32>
    %16 = arith.maximumf %14, %15 : vector<1x40xf32>
    %17 = arith.divf %10, %16 : vector<1x40xf32>
    %cst_6 = arith.constant 5.000000e-01 : f32
    %18 = vector.broadcast %cst_6 : f32 to vector<1x40xf32>
    %19 = arith.cmpf oge, %17, %18 : vector<1x40xf32>
    %cst_7 = arith.constant 2.000000e+00 : f32
    %20 = vector.broadcast %cst_7 : f32 to vector<1x40xf32>
    %21 = arith.cmpf ole, %17, %20 : vector<1x40xf32>
    %22 = arith.andi %19, %21 : vector<1x40xi1>
    %cst_8 = arith.constant 1.600000e+01 : f32
    %23 = vector.broadcast %cst_8 : f32 to vector<1x40xf32>
    %24 = arith.subf %23, %10 : vector<1x40xf32>
    %25 = vector.extract_strided_slice %1 {offsets = [2, 0], sizes = [1, 40], strides = [1, 1]} : vector<4x40xf32> to vector<1x40xf32>
    %26 = arith.mulf %24, %25 : vector<1x40xf32>
    %27 = math.floor %26 : vector<1x40xf32>
    %cst_9 = arith.constant 1.600000e+01 : f32
    %28 = vector.broadcast %cst_9 : f32 to vector<1x40xf32>
    %29 = arith.subf %28, %14 : vector<1x40xf32>
    %30 = vector.extract_strided_slice %1 {offsets = [3, 0], sizes = [1, 40], strides = [1, 1]} : vector<4x40xf32> to vector<1x40xf32>
    %31 = arith.mulf %29, %30 : vector<1x40xf32>
    %32 = math.floor %31 : vector<1x40xf32>
    %33 = arith.addf %27, %10 : vector<1x40xf32>
    %34 = arith.addf %32, %14 : vector<1x40xf32>
    %35 = arith.cmpf one, %27, %33 : vector<1x40xf32>
    %36 = arith.cmpf one, %32, %34 : vector<1x40xf32>
    %37 = arith.andi %35, %36 : vector<1x40xi1>
    %38 = arith.andi %22, %37 : vector<1x40xi1>
    %c0_10 = arith.constant 0 : index
    %c0_11 = arith.constant 0 : index
    %39 = vector.load %arg2[%c0_10, %c0_11] : memref<8x4xf32, #tpu.memory_space<vmem>>, vector<8x4xf32>
    %40 = vector.extract_strided_slice %39 {offsets = [0, 0], sizes = [8, 1], strides = [1, 1]} : vector<8x4xf32> to vector<8x1xf32>
    %41 = vector.extract_strided_slice %39 {offsets = [0, 1], sizes = [8, 1], strides = [1, 1]} : vector<8x4xf32> to vector<8x1xf32>
    %42 = vector.extract_strided_slice %39 {offsets = [0, 2], sizes = [8, 1], strides = [1, 1]} : vector<8x4xf32> to vector<8x1xf32>
    %43 = vector.extract_strided_slice %39 {offsets = [0, 3], sizes = [8, 1], strides = [1, 1]} : vector<8x4xf32> to vector<8x1xf32>
    %44 = arith.addf %40, %42 : vector<8x1xf32>
    %cst_12 = arith.constant 5.000000e-01 : f32
    %45 = vector.broadcast %cst_12 : f32 to vector<8x1xf32>
    %46 = arith.mulf %45, %44 : vector<8x1xf32>
    %47 = arith.addf %41, %43 : vector<8x1xf32>
    %cst_13 = arith.constant 5.000000e-01 : f32
    %48 = vector.broadcast %cst_13 : f32 to vector<8x1xf32>
    %49 = arith.mulf %48, %47 : vector<8x1xf32>
    %50 = vector.broadcast %27 : vector<1x40xf32> to vector<8x40xf32>
    %51 = vector.broadcast %46 : vector<8x1xf32> to vector<8x40xf32>
    %52 = arith.cmpf olt, %50, %51 : vector<8x40xf32>
    %53 = vector.broadcast %46 : vector<8x1xf32> to vector<8x40xf32>
    %54 = vector.broadcast %33 : vector<1x40xf32> to vector<8x40xf32>
    %55 = arith.cmpf olt, %53, %54 : vector<8x40xf32>
    %56 = arith.andi %52, %55 : vector<8x40xi1>
    %57 = vector.broadcast %32 : vector<1x40xf32> to vector<8x40xf32>
    %58 = vector.broadcast %49 : vector<8x1xf32> to vector<8x40xf32>
    %59 = arith.cmpf olt, %57, %58 : vector<8x40xf32>
    %60 = arith.andi %56, %59 : vector<8x40xi1>
    %61 = vector.broadcast %49 : vector<8x1xf32> to vector<8x40xf32>
    %62 = vector.broadcast %34 : vector<1x40xf32> to vector<8x40xf32>
    %63 = arith.cmpf olt, %61, %62 : vector<8x40xf32>
    %64 = arith.andi %60, %63 : vector<8x40xi1>
    %65 = arith.extui %64 : vector<8x40xi1> to vector<8x40xi32>
    %66 = arith.sitofp %65 : vector<8x40xi32> to vector<8x40xf32>
    %cst_14 = arith.constant dense<0xFF800000> : vector<40xf32>
    %67 = vector.multi_reduction <maximumf>, %66, %cst_14 [0] : vector<8x40xf32> to vector<40xf32>
    %68 = vector.shape_cast %67 : vector<40xf32> to vector<1x40xf32>
    %cst_15 = arith.constant 5.000000e-01 : f32
    %69 = vector.broadcast %cst_15 : f32 to vector<1x40xf32>
    %70 = arith.cmpf ogt, %68, %69 : vector<1x40xf32>
    %71 = arith.subf %42, %40 : vector<8x1xf32>
    %72 = arith.subf %43, %41 : vector<8x1xf32>
    %73 = arith.mulf %71, %72 : vector<8x1xf32>
    %74 = arith.mulf %10, %14 : vector<1x40xf32>
    %75 = vector.broadcast %42 : vector<8x1xf32> to vector<8x40xf32>
    %76 = vector.broadcast %33 : vector<1x40xf32> to vector<8x40xf32>
    %77 = arith.minimumf %75, %76 : vector<8x40xf32>
    %78 = vector.broadcast %40 : vector<8x1xf32> to vector<8x40xf32>
    %79 = vector.broadcast %27 : vector<1x40xf32> to vector<8x40xf32>
    %80 = arith.maximumf %78, %79 : vector<8x40xf32>
    %81 = arith.subf %77, %80 : vector<8x40xf32>
    %cst_16 = arith.constant 0.000000e+00 : f32
    %82 = vector.broadcast %cst_16 : f32 to vector<8x40xf32>
    %83 = arith.maximumf %81, %82 : vector<8x40xf32>
    %84 = vector.broadcast %43 : vector<8x1xf32> to vector<8x40xf32>
    %85 = vector.broadcast %34 : vector<1x40xf32> to vector<8x40xf32>
    %86 = arith.minimumf %84, %85 : vector<8x40xf32>
    %87 = vector.broadcast %41 : vector<8x1xf32> to vector<8x40xf32>
    %88 = vector.broadcast %32 : vector<1x40xf32> to vector<8x40xf32>
    %89 = arith.maximumf %87, %88 : vector<8x40xf32>
    %90 = arith.subf %86, %89 : vector<8x40xf32>
    %cst_17 = arith.constant 0.000000e+00 : f32
    %91 = vector.broadcast %cst_17 : f32 to vector<8x40xf32>
    %92 = arith.maximumf %90, %91 : vector<8x40xf32>
    %93 = arith.mulf %83, %92 : vector<8x40xf32>
    %94 = vector.broadcast %73 : vector<8x1xf32> to vector<8x40xf32>
    %95 = vector.broadcast %74 : vector<1x40xf32> to vector<8x40xf32>
    %96 = arith.addf %94, %95 : vector<8x40xf32>
    %97 = arith.subf %96, %93 : vector<8x40xf32>
    %cst_18 = arith.constant 9.99999971E-10 : f32
    %98 = vector.broadcast %cst_18 : f32 to vector<8x40xf32>
    %99 = arith.maximumf %97, %98 : vector<8x40xf32>
    %100 = arith.divf %93, %99 : vector<8x40xf32>
    %cst_19 = arith.constant -1.000000e+00 : f32
    %101 = vector.broadcast %cst_19 : f32 to vector<8x40xf32>
    %102 = arith.select %64, %100, %101 : vector<8x40xi1>, vector<8x40xf32>
    %cst_20 = arith.constant dense<0xFF800000> : vector<40xf32>
    %103 = vector.multi_reduction <maximumf>, %102, %cst_20 [0] : vector<8x40xf32> to vector<40xf32>
    %104 = vector.shape_cast %103 : vector<40xf32> to vector<1x40xf32>
    %105 = arith.andi %38, %70 : vector<1x40xi1>
    %106 = vector.broadcast %0 : f32 to vector<1x40xf32>
    %107 = arith.cmpf oge, %104, %106 : vector<1x40xf32>
    %108 = arith.andi %105, %107 : vector<1x40xi1>
    %109 = tpu.iota {dimensions = array<i32: 1>} : vector<1x40xi32>
    %110 = arith.sitofp %109 : vector<1x40xi32> to vector<1x40xf32>
    %cst_21 = arith.constant 4.000000e+01 : f32
    %111 = vector.broadcast %cst_21 : f32 to vector<1x40xf32>
    %112 = arith.select %108, %110, %111 : vector<1x40xi1>, vector<1x40xf32>
    %cst_22 = arith.constant dense<0x7F800000> : vector<1xf32>
    %113 = vector.multi_reduction <minimumf>, %112, %cst_22 [1] : vector<1x40xf32> to vector<1xf32>
    %114 = vector.shape_cast %113 : vector<1xf32> to vector<1x1xf32>
    %115 = vector.broadcast %114 : vector<1x1xf32> to vector<1x40xf32>
    %116 = arith.cmpf oeq, %110, %115 : vector<1x40xf32>
    %117 = arith.andi %116, %108 : vector<1x40xi1>
    %118 = arith.extui %117 : vector<1x40xi1> to vector<1x40xi32>
    %119 = arith.sitofp %118 : vector<1x40xi32> to vector<1x40xf32>
    %120 = arith.extui %108 : vector<1x40xi1> to vector<1x40xi32>
    %121 = arith.sitofp %120 : vector<1x40xi32> to vector<1x40xf32>
    %cst_23 = arith.constant dense<0xFF800000> : vector<1xf32>
    %122 = vector.multi_reduction <maximumf>, %121, %cst_23 [1] : vector<1x40xf32> to vector<1xf32>
    %123 = vector.shape_cast %122 : vector<1xf32> to vector<1x1xf32>
    %cst_24 = arith.constant 5.000000e-01 : f32
    %124 = vector.broadcast %cst_24 : f32 to vector<1x1xf32>
    %125 = arith.cmpf ogt, %123, %124 : vector<1x1xf32>
    %cst_25 = arith.constant 1.000000e+00 : f32
    %126 = arith.cmpf olt, %0, %cst_25 : f32
    %127 = vector.broadcast %126 : i1 to vector<1x1xi1>
    %128 = arith.andi %125, %127 : vector<1x1xi1>
    %129 = arith.mulf %27, %119 : vector<1x40xf32>
    %cst_26 = arith.constant dense<0.000000e+00> : vector<1xf32>
    %130 = vector.multi_reduction <add>, %129, %cst_26 [1] : vector<1x40xf32> to vector<1xf32>
    %131 = vector.shape_cast %130 : vector<1xf32> to vector<1x1xf32>
    %132 = arith.mulf %32, %119 : vector<1x40xf32>
    %cst_27 = arith.constant dense<0.000000e+00> : vector<1xf32>
    %133 = vector.multi_reduction <add>, %132, %cst_27 [1] : vector<1x40xf32> to vector<1xf32>
    %134 = vector.shape_cast %133 : vector<1xf32> to vector<1x1xf32>
    %135 = arith.mulf %10, %119 : vector<1x40xf32>
    %cst_28 = arith.constant dense<0.000000e+00> : vector<1xf32>
    %136 = vector.multi_reduction <add>, %135, %cst_28 [1] : vector<1x40xf32> to vector<1xf32>
    %137 = vector.shape_cast %136 : vector<1xf32> to vector<1x1xf32>
    %138 = arith.mulf %14, %119 : vector<1x40xf32>
    %cst_29 = arith.constant dense<0.000000e+00> : vector<1xf32>
    %139 = vector.multi_reduction <add>, %138, %cst_29 [1] : vector<1x40xf32> to vector<1xf32>
    %140 = vector.shape_cast %139 : vector<1xf32> to vector<1x1xf32>
    %141 = tpu.iota {dimensions = array<i32: 1>} : vector<8x4xi32>
    %c1_i32 = arith.constant 1 : i32
    %142 = vector.broadcast %c1_i32 : i32 to vector<8x4xi32>
    %143 = arith.andi %141, %142 : vector<8x4xi32>
    %c0_i32 = arith.constant 0 : i32
    %144 = vector.broadcast %c0_i32 : i32 to vector<8x4xi32>
    %145 = arith.cmpi eq, %143, %144 : vector<8x4xi32>
    %146 = vector.shape_cast %131 : vector<1x1xf32> to vector<1x1xf32>
    %147 = vector.broadcast %146 : vector<1x1xf32> to vector<8x4xf32>
    %148 = vector.shape_cast %134 : vector<1x1xf32> to vector<1x1xf32>
    %149 = vector.broadcast %148 : vector<1x1xf32> to vector<8x4xf32>
    %150 = arith.select %145, %147, %149 : vector<8x4xi1>, vector<8x4xf32>
    %151 = vector.shape_cast %137 : vector<1x1xf32> to vector<1x1xf32>
    %152 = vector.broadcast %151 : vector<1x1xf32> to vector<8x4xf32>
    %153 = vector.shape_cast %140 : vector<1x1xf32> to vector<1x1xf32>
    %154 = vector.broadcast %153 : vector<1x1xf32> to vector<8x4xf32>
    %155 = arith.select %145, %152, %154 : vector<8x4xi1>, vector<8x4xf32>
    %156 = arith.subf %39, %150 : vector<8x4xf32>
    %cst_30 = arith.constant 0.000000e+00 : f32
    %157 = vector.broadcast %cst_30 : f32 to vector<8x4xf32>
    %158 = arith.maximumf %157, %156 : vector<8x4xf32>
    %159 = arith.minimumf %155, %158 : vector<8x4xf32>
    %160 = vector.shape_cast %128 : vector<1x1xi1> to vector<1x1xi1>
    %161 = vector.broadcast %160 : vector<1x1xi1> to vector<8x4xi1>
    %162 = arith.select %161, %159, %39 : vector<8x4xi1>, vector<8x4xf32>
    %c0_31 = arith.constant 0 : index
    %c0_32 = arith.constant 0 : index
    %163 = vector.load %arg4[%c0_31, %c0_32] : memref<8x4xf32, #tpu.memory_space<vmem>>, vector<8x4xf32>
    tpu.vector_store %arg4[%c0_31, %c0_32], %162 {strides = array<i32>} : memref<8x4xf32, #tpu.memory_space<vmem>>, vector<8x4xf32>,
    %164 = vector.broadcast %119 : vector<1x40xf32> to vector<8x40xf32>
    %165 = arith.mulf %66, %164 : vector<8x40xf32>
    %cst_33 = arith.constant dense<0xFF800000> : vector<8xf32>
    %166 = vector.multi_reduction <maximumf>, %165, %cst_33 [1] : vector<8x40xf32> to vector<8xf32>
    %167 = vector.shape_cast %166 : vector<8xf32> to vector<8x1xf32>
    %cst_34 = arith.constant 1.000000e+00 : f32
    %168 = vector.shape_cast %128 : vector<1x1xi1> to vector<1x1xi1>
    %169 = vector.broadcast %168 : vector<1x1xi1> to vector<8x1xi1>
    %170 = vector.broadcast %cst_34 : f32 to vector<8x1xf32>
    %171 = arith.select %169, %167, %170 : vector<8x1xi1>, vector<8x1xf32>
    %c0_35 = arith.constant 0 : index
    %c0_36 = arith.constant 0 : index
    %172 = vector.load %arg6[%c0_35, %c0_36] : memref<8x1xf32, #tpu.memory_space<vmem>>, vector<8x1xf32>
    tpu.vector_store %arg6[%c0_35, %c0_36], %171 {strides = array<i32>} : memref<8x1xf32, #tpu.memory_space<vmem>>, vector<8x1xf32>,
    %c0_37 = arith.constant 0 : index
    %c0_38 = arith.constant 0 : index
    %173 = vector.load %arg3[%c0_37, %c0_38] : memref<3x256xf32, #tpu.memory_space<vmem>>, vector<3x256xf32>
    %174 = tpu.iota {dimensions = array<i32: 1>} : vector<1x256xi32>
    %175 = arith.sitofp %174 : vector<1x256xi32> to vector<1x256xf32>
    %cst_39 = arith.constant 1.600000e+01 : f32
    %176 = vector.broadcast %cst_39 : f32 to vector<1x256xf32>
    %177 = arith.divf %175, %176 : vector<1x256xf32>
    %178 = math.floor %177 : vector<1x256xf32>
    %cst_40 = arith.constant 1.600000e+01 : f32
    %179 = vector.broadcast %cst_40 : f32 to vector<1x256xf32>
    %180 = arith.mulf %178, %179 : vector<1x256xf32>
    %181 = arith.subf %175, %180 : vector<1x256xf32>
    %182 = vector.broadcast %131 : vector<1x1xf32> to vector<1x256xf32>
    %183 = arith.cmpf oge, %181, %182 : vector<1x256xf32>
    %184 = arith.addf %131, %137 : vector<1x1xf32>
    %185 = vector.broadcast %184 : vector<1x1xf32> to vector<1x256xf32>
    %186 = arith.cmpf olt, %181, %185 : vector<1x256xf32>
    %187 = arith.andi %183, %186 : vector<1x256xi1>
    %188 = vector.broadcast %134 : vector<1x1xf32> to vector<1x256xf32>
    %189 = arith.cmpf oge, %178, %188 : vector<1x256xf32>
    %190 = arith.andi %187, %189 : vector<1x256xi1>
    %191 = arith.addf %134, %140 : vector<1x1xf32>
    %192 = vector.broadcast %191 : vector<1x1xf32> to vector<1x256xf32>
    %193 = arith.cmpf olt, %178, %192 : vector<1x256xf32>
    %194 = arith.andi %190, %193 : vector<1x256xi1>
    %cst_41 = arith.constant dense<true> : vector<1x1xi1>
    %195 = arith.xori %128, %cst_41 : vector<1x1xi1>
    %196 = vector.broadcast %195 : vector<1x1xi1> to vector<1x256xi1>
    %197 = arith.ori %194, %196 : vector<1x256xi1>
    %cst_42 = arith.constant 0.000000e+00 : f32
    %198 = vector.broadcast %cst_42 : f32 to vector<3x256xf32>
    %199 = vector.shape_cast %197 : vector<1x256xi1> to vector<1x256xi1>
    %200 = vector.broadcast %199 : vector<1x256xi1> to vector<3x256xi1>
    %201 = arith.select %200, %173, %198 : vector<3x256xi1>, vector<3x256xf32>
    %c0_43 = arith.constant 0 : index
    %c0_44 = arith.constant 0 : index
    %202 = vector.load %arg5[%c0_43, %c0_44] : memref<3x256xf32, #tpu.memory_space<vmem>>, vector<3x256xf32>
    tpu.vector_store %arg5[%c0_43, %c0_44], %201 {strides = array<i32>} : memref<3x256xf32, #tpu.memory_space<vmem>>, vector<3x256xf32>,
    return
  }
}

</mosaic_0001>

<bundles_post_ra>
// kernel: tpu_custom_call.1
= control target key start
LH: loop header
LB: loop body
LE: loop exit
PB: predicated region body
PF: predicated region fallthrough
CT: control target
= control target key end

     0   :  { %s602_s0 = inlined_call_operand.<no memory space> [shape: f32[1], index: 0, kind: input, shape index: {}]   ;;  %s603_s1 = inlined_call_operand.vmem [shape: f32[4,40], index: 1, kind: input, shape index: {}]   ;;  %s604_s2 = inlined_call_operand.vmem [shape: f32[8,4], index: 2, kind: input, shape index: {}]   ;;  %s605_s3 = inlined_call_operand.vmem [shape: f32[3,256], index: 3, kind: input, shape index: {}]   ;;  %s606_s4 = inlined_call_operand.vmem [shape: f32[8,4], index: 4, kind: output, shape index: {0}]   ;;  %s607_s5 = inlined_call_operand.hbm [shape: f32[3,256], index: 5, kind: output, shape index: {1}]   ;;  %s608_s6 = inlined_call_operand.vmem [shape: f32[8,1], index: 6, kind: output, shape index: {2}]  }
   0x1   :  { %v441_v0 = vld [vmem:[%s604_s2] sm:$0xff] }
   0x2   :  { %13 = vsyncpa [#allocation4], 0  ;;  %s392_s23 = smov 2   ;;  %s393_s24 = smov 126   ;;  %v394_v1 = vmov 2   ;;  %v395_v2 = vmov 1  }
   0x3   :  { %101 = vrot.lane.b32.xlu0 %v441_v0, %s392_s23  ;;  %65 = vrot.lane.b32.xlu1 %v441_v0, %s393_s24  ;;  %s396_s25 = smov 127   ;;  %v397_v5 = vmov 0   ;;  %v398_v6 = vmov 3   ;;  %v23_v12 = vld [vmem:[%s603_s1] sm:$0xf]  ;;  %vm92_vm5 = vcmask 326656  }
   0x4   :  { %353 = vset.pattern.permute.xlu1 %v394_v1  ;;  %356 = vset.pattern.permute.xlu0 %v395_v2  ;;  %v24_v13 = vmul.f32 0.7, %v23_v12  ;;  %v52_v18 = vrot.slane %v23_v12, 2  ;;  %v399_v57 = vmov 0.0   ;;  %p193_p0 = scmp.lt.f32.partialorder %s602_s0, 1.0  ;;  %s402_s11 = smov [#allocation3]  }
   0x5   :  { %354 = vset.pattern.permute.xlu2 %v397_v5  ;;  %s322_s12 = sshll.u32 %s402_s11, 4  ;;  %s324_s15 = sshll.u32 %s607_s5, 4  ;;  %s323_s12 = int_to_ptr.vmem [resolvable:$true] %s322_s12  ;;  %s325_s15 = int_to_ptr.hbm [resolvable:$true] %s324_s15 }
   0x6   :  { %120 = vperm.xlu2 %354, %v441_v0   ;;  %v25_v14 = vadd.f32 0.3, %v24_v13 }
   0x8   :  { %v26_v15 = vmul.f32 16.0, %v25_v14 }
   0xa   :  { %v456_v16 = vfloor.f32 %v26_v15 }
   0xb   :  { %115 = vperm.xlu1 %353, %v441_v0  }
   0xc   :  { %v50_v17 = vsub.f32 16.0, %v456_v16  ;;  %v28_v30 = vmax.f32 %v456_v16, 1e-09  ;;  %v111_v35 = vrot.slane %v456_v16, 1 }
   0xe   :  { %355 = vset.pattern.permute.xlu2 %v398_v6  ;;  %v54_v19 = vmul.f32 %v52_v18, %v50_v17  ;;  %v30_v36 = vrot.slane %v28_v30, 1  ;;  %v113_v39 = vmul.f32 %v111_v35, %v456_v16  ;;  %v175_v30 = vlaneseq }
   0xf   :  { %127 = vperm.xlu2 %355, %v441_v0  }
  0x10   :  { %v459_v21 = vfloor.f32 %v54_v19  ;;  %360 = vrcp.f32 %v30_v36  ;;  %v144_v42 = vperm.slane %v113_v39, 0  ;;  %vm37_vm8 = vweird.f32 %v30_v36 }
  0x11   :  { %v43_v62 = vand.u32 2147483648, %v30_v36 }
  0x12   :  { %v463_v22 = vadd.f32 %v459_v21, %v456_v16  ;;  %v80_v23 = vperm.slane %v459_v21, 1  ;;  %v70_v24 = vperm.slane %v459_v21, 0 }
  0x14   :  { %v77_v25 = vperm.slane %v463_v22, 0  ;;  %v87_v27 = vperm.slane %v463_v22, 1  ;;  %vm57_vm15 = vcmp.ne.f32.partialorder %v459_v21, %v463_v22 }
  0x15   :  { %v58_v19 = vsel %vm57_vm15, 1, %v397_v5 }
  0x16   :  { %v361_v44 = vpop.eup %360 }
  0x17   :  { %357 = vset.pattern.permute.xlu2 %v397_v5  ;;  %v33_v49 = vmul.f32 %v361_v44, %v30_v36  ;;  %vm38_vm9 = vweird.f32 %v361_v44 }
  0x18   :  { %vm494_vm10 = vmor %vm37_vm8, %vm38_vm9 }
  0x19   :  { %v34_v51 = vsub.f32 1.0, %v33_v49 }
  0x1b   :  { %v35_v55 = vmul.f32 %v361_v44, %v34_v51 }
  0x60   :  { %v121_v20 = vpop.permute.xlu2 %120 }
  0x61   :  { %v123_v32 = vmax.f32 %v121_v20, %v70_v24 }
  0x69   :  { %v128_v29 = vpop.permute.xlu2 %127 }
  0x6a   :  { %v130_v34 = vmin.f32 %v128_v29, %v87_v27 }
  0x75   :  { %v102_v3 = vpop.permute.xlu0 %101  ;;  %v66_v7 = vpop.permute.xlu1 %65 }
  0x76   :  { %v104_v4 = vsub.f32 %v441_v0, %v102_v3  ;;  %v68_v8 = vadd.f32 %v66_v7, %v441_v0 }
  0x78   :  { %106 = vrot.lane.b32.xlu0 %v104_v4, %s396_s25  ;;  %v69_v9 = vmul.f32 0.5, %v68_v8 }
  0x7a   :  { %73 = vperm.xlu2 %357, %v69_v9  }
  0x7d   :  { %v116_v28 = vpop.permute.xlu1 %115 }
  0x7e   :  { %v118_v33 = vmin.f32 %v116_v28, %v77_v25 }
  0x80   :  { %132 = vperm.xlu0 %356, %v441_v0   ;;  %v124_v37 = vsub.f32 %v118_v33, %v123_v32 }
  0x82   :  { %v125_v40 = vmax.f32 %v124_v37, 0.0 }
  0x88   :  { %359 = vset.pattern.permute.xlu0 %v394_v1  ;;  %v36_v1 = vadd.f32 %v361_v44, %v35_v55 }
  0xd4   :  { %v74_v48 = vpop.permute.xlu2 %73 }
  0xd5   :  { %vm76_vm0 = vcmp.lt.f32.partialorder %v70_v24, %v74_v48  ;;  %vm78_vm1 = vcmp.lt.f32.partialorder %v74_v48, %v77_v25 }
  0xd6   :  { %vm79_vm2 = vmand %vm76_vm0, %vm78_vm1 }
  0xea   :  { %v107_v10 = vpop.permute.xlu0 %106 }
  0xeb   :  { %v109_v11 = vmul.f32 %v107_v10, %v104_v4 }
  0xed   :  { %141 = vperm.xlu1 %353, %v109_v11   ;;  %v40_v11 = vsel %vm494_vm10, %v361_v44, %v36_v1 }
  0xf2   :  { %v133_v26 = vpop.permute.xlu0 %132 }
  0xf3   :  { %v135_v31 = vmax.f32 %v133_v26, %v80_v23  ;;  %v59_v26 = vrot.slane %v58_v19, 1 }
  0xf5   :  { %358 = vset.pattern.permute.xlu1 %v395_v2  ;;  %v136_v38 = vsub.f32 %v130_v34, %v135_v31  ;;  %v41_v2 = vand.u32 2147483647, %v30_v36  ;;  %v516_v34 = vand.u32 127, %v175_v30  ;;  %v172_v36 = vstv %s602_s0 }
  0xf6   :  { %82 = vperm.xlu1 %358, %v69_v9   ;;  %v44_v9 = vor.u32 1.1754944e-38, %v43_v62 }
  0xf7   :  { %v137_v41 = vmax.f32 %v136_v38, 0.0  ;;  %vm42_vm13 = vcmp.eq.f32.partialorder %v41_v2, 8.507059e+37  ;;  %v522_v38 = vcvt.s32.f32 %v516_v34 }
  0xf8   :  { %v45_v17 = vsel %vm42_vm13, %v44_v9, %v40_v11 }
  0xf9   :  { %v138_v45 = vmul.f32 %v137_v41, %v125_v40  ;;  %v46_v24 = vmul.f32 %v45_v17, %v456_v16 }
  0xfb   :  { %vm47_vm1 = vcmp.ge.f32.partialorder %v46_v24, 0.5 }
 0x15f   :  { %v142_v43 = vpop.permute.xlu1 %141 }
 0x160   :  { %v145_v46 = vadd.f32 %v144_v42, %v142_v43 }
 0x162   :  { %v146_v47 = vsub.f32 %v145_v46, %v138_v45 }
 0x164   :  { %v147_v50 = vmax.f32 %v146_v47, 1e-09 }
 0x166   :  { %362 = vrcp.f32 %v147_v50  ;;  %v159_v4 = vand.u32 2147483648, %v147_v50  ;;  %v157_v8 = vand.u32 2147483647, %v147_v50  ;;  %vm153_vm12 = vweird.f32 %v147_v50 }
 0x168   :  { %v83_v52 = vpop.permute.xlu1 %82  ;;  %v160_v13 = vor.u32 1.1754944e-38, %v159_v4  ;;  %vm158_vm0 = vcmp.eq.f32.partialorder %v157_v8, 8.507059e+37 }
 0x169   :  { %vm85_vm3 = vcmp.lt.f32.partialorder %v80_v23, %v83_v52  ;;  %vm472_vm4 = vcmp.lt.f32.partialorder %v83_v52, %v87_v27 }
 0x16a   :  { %vm476_vm6 = vmand %vm79_vm2, %vm85_vm3  ;;  %vm48_vm2 = vcmp.le.f32.partialorder %v46_v24, 2.0  ;;  %vm60_vm3 = vcmp.ne.s32.totalorder %v59_v26, 0 }
 0x16b   :  { %vm89_vm7 = vmand %vm476_vm6, %vm472_vm4 }
 0x16c   :  { %v363_v56 = vpop.eup %362  ;;  %v490_v58 = vsel %vm89_vm7, 1.0, %v399_v57  ;;  %vm49_vm8 = vmand %vm47_vm1, %vm48_vm2 }
 0x16d   :  { %v149_v59 = vmul.f32 %v363_v56, %v147_v50  ;;  %v93_v60 = vsel %vm92_vm5, %v490_v58, -inf  ;;  %vm154_vm11 = vweird.f32 %v363_v56  ;;  %vm61_vm4 = vmand %vm57_vm15, %vm60_vm3  ;;  %vm206_vm15 = vcmask 320513  }
 0x16e   :  { %v94_v61 = vrot.slane %v93_v60, 4  ;;  %vm155_vm14 = vmor %vm153_vm12, %vm154_vm11  ;;  %vm179_vm11 = vcmask 319488  }
 0x16f   :  { %v150_v63 = vsub.f32 1.0, %v149_v59  ;;  %vm62_vm6 = vmand %vm49_vm8, %vm61_vm4 }
 0x170   :  { %v95_v3 = vmax.f32 %v93_v60, %v94_v61  ;;  %v244_v61 = vadd.s32 128, %v516_v34 }
 0x171   :  { %v151_v7 = vmul.f32 %v363_v56, %v150_v63 }
 0x172   :  { %v96_v12 = vrot.slane %v95_v3, 2  ;;  %v245_v63 = vcvt.s32.f32 %v244_v61 }
 0x173   :  { %v152_v10 = vadd.f32 %v363_v56, %v151_v7 }
 0x174   :  { %v97_v20 = vmax.f32 %v95_v3, %v96_v12 }
 0x175   :  { %v156_v14 = vsel %vm155_vm14, %v363_v56, %v152_v10  ;;  %v400_v56 = vmov 16.0   ;;  %v218_v10 = vand.u32 1, %v516_v34 }
 0x176   :  { %v161_v15 = vsel %vm158_vm0, %v160_v13, %v156_v14  ;;  %v98_v28 = vrot.slane %v97_v20, 1  ;;  %364 = vrcp.f32 %v400_v56 }
 0x177   :  { %v162_v18 = vmul.f32 %v161_v15, %v138_v45  ;;  %vm558_vm3 = vcmp.eq.s32.totalorder %v218_v10, 0 }
 0x178   :  { %v99_v32 = vmax.f32 %v97_v20, %v98_v28 }
 0x179   :  { %v163_v23 = vsel %vm89_vm7, %v162_v18, -1.0 }
 0x17a   :  { %v164_v25 = vsel %vm92_vm5, %v163_v23, -inf  ;;  %vm100_vm7 = vcmp.gt.f32.partialorder %v99_v32, 0.5 }
 0x17b   :  { %v165_v27 = vrot.slane %v164_v25, 4  ;;  %vm171_vm9 = vmand %vm62_vm6, %vm100_vm7 }
 0x17c   :  { %v365_v59 = vpop.eup %364 }
 0x17d   :  { %v166_v29 = vmax.f32 %v164_v25, %v165_v27  ;;  %v247_v60 = vmul.f32 16.0, %v365_v59  ;;  %vm251_vm0 = vweird.f32 %v365_v59 }
 0x17f   :  { %v167_v31 = vrot.slane %v166_v29, 2 }
 0x181   :  { %v168_v33 = vmax.f32 %v166_v29, %v167_v31 }
 0x183   :  { %v169_v35 = vrot.slane %v168_v33, 1 }
 0x185   :  { %v170_v37 = vmax.f32 %v168_v33, %v169_v35 }
 0x187   :  { %vm173_vm10 = vcmp.ge.f32.partialorder %v170_v37, %v172_v36 }
 0x188   :  { %vm524_vm12 = vmand %vm171_vm9, %vm173_vm10 }
 0x189   :  { %v178_v22 = vsel %vm524_vm12, %v522_v38, 40.0  ;;  %v341_v53 = vsel %vm524_vm12, 1.0, %v399_v57 }
 0x18a   :  { %v180_v40 = vsel %vm179_vm11, %v178_v22, inf }
 0x18b   :  { %181 = vmin.xlane.f32.xlu2 %v180_v40 }
 0x1fe   :  { %v182_v41 = vpop.xlane.xlu2 %181 }
 0x1ff   :  { %vm183_vm13 = vcmp.eq.f32.partialorder %v522_v38, %v182_v41 }
 0x200   :  { %vm184_vm14 = vmand %vm183_vm13, %vm524_vm12 }
 0x201   :  { %v340_v42 = vsel %vm184_vm14, 1.0, %v399_v57 }
 0x202   :  { %v198_v43 = vmul.f32 %v340_v42, %v459_v21  ;;  %v203_v44 = vrot.slane %v340_v42, 7  ;;  %v235_v50 = vperm.slane %v340_v42, 0  ;;  %v210_v51 = vmul.f32 %v340_v42, %v456_v16 }
 0x204   :  { %v199_v45 = vsel %vm179_vm11, %v198_v43, 0.0  ;;  %v214_v46 = vmul.f32 %v203_v44, %v456_v16  ;;  %v205_v47 = vmul.f32 %v203_v44, %v459_v21  ;;  %v236_v52 = vmul.f32 %v490_v58, %v235_v50  ;;  %v243_v58 = vld [vmem:[%s605_s3] sm:$0x77]  ;;  %s194_s3 = scalar_select %p193_p0, 1, 0 }
 0x205   :  { %200 = vadd.xlane.f32.xlu2 %v199_v45  ;;  %v211_v54 = vsel %vm179_vm11, %v210_v51, 0.0  ;;  %v189_v21 = vsel %vm179_vm11, %v341_v53, -inf  ;;  %v248_v16 = vsub.f32 1.0, %v247_v60  ;;  %301 = vst [vmem:[#allocation1] ss:$2 sm:$0xff] %v243_v58 }
 0x206   :  { %v215_v48 = vsel %vm206_vm15, %v214_v46, 0.0  ;;  %v207_v49 = vsel %vm206_vm15, %v205_v47, 0.0  ;;  %v237_v55 = vsel %vm92_vm5, %v236_v52, -inf  ;;  %v195_v27 = vstv %s194_s3 }
 0x207   :  { %216 = vadd.xlane.f32.xlu1 %v215_v48  ;;  %208 = vadd.xlane.f32.xlu0 %v207_v49  ;;  %v249_v57 = vmul.f32 %v365_v59, %v248_v16  ;;  %vm196_vm11 = vcmp.eq.s32.totalorder %v195_v27, 1 }
 0x209   :  { %v250_v62 = vadd.f32 %v365_v59, %v249_v57 }
 0x20b   :  { %v252_v1 = vsel %vm251_vm0, %v365_v59, %v250_v62 }
 0x20c   :  { %v253_v2 = vmul.f32 %v252_v1, %v522_v38  ;;  %v254_v3 = vmul.f32 %v252_v1, %v245_v63  ;;  %v303_v51 = vld.sshfl [vmem:[#allocation1 + $0x8] sm:$0xff pattern:$0x75316420] }
 0x20d   :  { %212 = vadd.xlane.f32.xlu2 %v211_v54 }
 0x20e   :  { %v255_v4 = vfloor.f32 %v253_v2  ;;  %v256_v7 = vfloor.f32 %v254_v3 }
 0x20f   :  { %238 = vmax.xlane.f32.xlu1 %v237_v55  ;;  %190 = vmax.xlane.f32.xlu0 %v189_v21 }
 0x210   :  { %v257_v11 = vmul.f32 16.0, %v255_v4  ;;  %v258_v13 = vmul.f32 16.0, %v256_v7 }
 0x212   :  { %v259_v18 = vsub.f32 %v522_v38, %v257_v11  ;;  %v260_v23 = vsub.f32 %v245_v63, %v258_v13 }
 0x278   :  { %v201_v6 = vpop.xlane.xlu2 %200 }
 0x279   :  { %v220_v20 = vperm.slane %v201_v6, 0  ;;  %vm261_vm4 = vcmp.ge.f32.partialorder %v259_v18, %v201_v6  ;;  %vm262_vm9 = vcmp.ge.f32.partialorder %v260_v23, %v201_v6 }
 0x27a   :  { %v217_v8 = vpop.xlane.xlu1 %216  ;;  %v209_v9 = vpop.xlane.xlu0 %208 }
 0x27b   :  { %vm268_vm5 = vcmp.ge.f32.partialorder %v255_v4, %v209_v9  ;;  %vm269_vm1 = vcmp.ge.f32.partialorder %v256_v7, %v209_v9  ;;  %v278_v12 = vadd.f32 %v217_v8, %v209_v9  ;;  %v221_v14 = vperm.slane %v209_v9, 1 }
 0x27c   :  { %v270_v15 = vsel %vm268_vm5, 1, %v397_v5  ;;  %v271_v19 = vsel %vm269_vm1, 1, %v397_v5  ;;  %v224_v22 = vperm.slane %v217_v8, 1 }
 0x27d   :  { %vm279_vm2 = vcmp.lt.f32.partialorder %v255_v4, %v278_v12  ;;  %vm280_vm8 = vcmp.lt.f32.partialorder %v256_v7, %v278_v12  ;;  %v272_v25 = vrot.slane %v270_v15, 1  ;;  %v222_v29 = vsel %vm558_vm3, %v220_v20, %v221_v14 }
 0x27e   :  { %v281_v28 = vsel %vm279_vm2, 1, %v397_v5  ;;  %v273_v30 = vrot.slane %v271_v19, 1  ;;  %v282_v31 = vsel %vm280_vm8, 1, %v397_v5  ;;  %v226_v36 = vsub.f32 %v441_v0, %v222_v29 }
 0x27f   :  { %v283_v35 = vrot.slane %v281_v28, 1  ;;  %vm573_vm12 = vcmp.ne.s32.totalorder %v272_v25, 0  ;;  %v284_v39 = vrot.slane %v282_v31, 1 }
 0x280   :  { %v213_v24 = vpop.xlane.xlu2 %212  ;;  %vm275_vm15 = vcmp.ne.s32.totalorder %v273_v30, 0  ;;  %v227_v41 = vmax.f32 %v226_v36, 0.0 }
 0x281   :  { %v263_v26 = vadd.f32 %v213_v24, %v201_v6  ;;  %v223_v33 = vperm.slane %v213_v24, 0  ;;  %vm285_vm1 = vcmp.ne.s32.totalorder %v283_v35, 0  ;;  %vm286_vm8 = vcmp.ne.s32.totalorder %v284_v39, 0 }
 0x282   :  { %v191_v32 = vpop.xlane.xlu0 %190  ;;  %v239_v45 = vpop.xlane.xlu1 %238 }
 0x283   :  { %vm264_vm6 = vcmp.lt.f32.partialorder %v259_v18, %v263_v26  ;;  %vm265_vm7 = vcmp.lt.f32.partialorder %v260_v23, %v263_v26  ;;  %vm192_vm14 = vcmp.gt.f32.partialorder %v191_v32, 0.5  ;;  %v225_v40 = vsel %vm558_vm3, %v223_v33, %v224_v22 }
 0x284   :  { %vm568_vm10 = vmand %vm261_vm4, %vm264_vm6  ;;  %v228_v44 = vmin.f32 %v225_v40, %v227_v41 }
 0x285   :  { %vm577_vm13 = vmand %vm262_vm9, %vm265_vm7  ;;  %vm233_vm7 = vcmask 31744   ;;  %vm401_vm9 = vmmov 1  }
 0x286   :  { %vm276_vm0 = vmand %vm568_vm10, %vm573_vm12  ;;  %vm241_vm12 = vcmask 7168  }
 0x287   :  { %vm277_vm5 = vmand %vm577_vm13, %vm275_vm15 }
 0x288   :  { %vm197_vm2 = vmand %vm192_vm14, %vm196_vm11 }
 0x289   :  { %v229_v42 = vsel %vm197_vm2, 1, %v397_v5  ;;  %vm287_vm4 = vmand %vm276_vm0, %vm285_vm1  ;;  %vm311_vm0 = vcmask 1043456  }
 0x28a   :  { %v230_v43 = vperm.slane %v229_v42, 0  ;;  %vm288_vm6 = vmand %vm277_vm5, %vm286_vm8 }
 0x28b   :  { %vm289_vm10 = vmxor %vm197_vm2, %vm401_vm9 }
 0x28c   :  { %vm231_vm13 = vcmp.eq.s32.totalorder %v230_v43, 1  ;;  %vm292_vm15 = vmor %vm287_vm4, %vm289_vm10 }
 0x28d   :  { %v232_v46 = vsel %vm231_vm13, %v228_v44, %v441_v0  ;;  %v240_v47 = vsel %vm231_vm13, %v239_v45, 1.0  ;;  %vm293_vm3 = vmor %vm288_vm6, %vm289_vm10  ;;  %v294_v48 = vsel %vm292_vm15, 1, %v397_v5  ;;  %v302_v0 = vld.sshfl [vmem:[#allocation1] sm:$0xff pattern:$0x75316420] }
 0x28e   :  { %234 = vst.msk [vmem:[%s606_s4] sm:$0xff] %vm233_vm7, %v232_v46  ;;  %v295_v49 = vsel %vm293_vm3, 1, %v397_v5  ;;  %v296_v50 = vperm.slane %v294_v48, 0 }
 0x28f   :  { %242 = vst.msk [vmem:[%s608_s6] sm:$0xff] %vm241_vm12, %v240_v47  ;;  %v297_v52 = vperm.slane %v295_v49, 0 }
 0x290   :  { %vm298_vm11 = vcmp.eq.s32.totalorder %v296_v50, 1 }
 0x291   :  { %vm299_vm14 = vcmp.eq.s32.totalorder %v297_v52, 1  ;;  %v306_v5 = vsel %vm298_vm11, %v302_v0, 0.0 }
 0x292   :  { %v307_v53 = vsel %vm299_vm14, %v303_v51, 0.0 }
 0x293   :  { %v310_v54 = vrot.slane %v307_v53, 4 }
 0x295   :  { %v312_v55 = vsel %vm311_vm0, %v306_v5, %v310_v54 }
 0x296   :  { %314 = vst [vmem:[#allocation3] sm:$0x77] %v312_v55 }
 0x297   :  { %327 = dma.vmem_to_hbm [thread:$0]  %s323_s12, 128, %s325_s15, [#allocation4]  }
 0x298   :  { %390 = dma.done.wait [#allocation4], 128  }
 0x299   :  { %391 = vsyncadd [#allocation4], 4294967168 }
 0x29a   :  { %338 = vsyncpa [#allocation4], 1 }

</bundles_post_ra>
